<compile_context>
chip_gen: v6e
topology: v6e:2x2x1
jax: 0.10.0
libtpu: 0.0.40
codegen_flags: <defaults>
</compile_context>

<pallas_src>
import functools

import jax
import jax.numpy as jnp
from jax.experimental import pallas as pl
from jax.experimental.pallas import tpu as pltpu


INPUT_DIM = 5
LAYER_NEURON = [10, 20, 5, 3, 2]
LANE = 128  # pad batch (lane axis) to a multiple of this for unmasked stores


def fused_mlp_kernel(xT_ref, w_ref, b_ref, out_ref):
    """Single fused affine layer, batch on the lane axis.

    xT_ref : (in_dim, batch_padded)   activations, lane-dense over batch
    w_ref  : (out_dim, in_dim)        fused weight (already transposed)
    b_ref  : (out_dim, 1)             fused bias (broadcast over lanes)
    out_ref: (out_dim, batch_padded)
    """
    out_ref[...] = (
        jnp.dot(w_ref[...], xT_ref[...], preferred_element_type=jnp.float32)
        + b_ref[...]
    ).astype(out_ref.dtype)


def init_params(key, input_dim, layer_neuron):
    """Deterministic init mimicking nn.Linear's U(-1/sqrt(fan_in), 1/sqrt(fan_in)).

    Weights are stored as (in, out); biases as (1, out) — i.e. y = x @ W + b.
    """
    params = []
    dims = [input_dim] + list(layer_neuron)
    for i in range(len(layer_neuron)):
        fan_in, fan_out = dims[i], dims[i + 1]
        key, kw, kb = jax.random.split(key, 3)
        bound = 1.0 / jnp.sqrt(jnp.float32(fan_in))
        w = jax.random.uniform(kw, (fan_in, fan_out), jnp.float32, -bound, bound)
        b = jax.random.uniform(kb, (1, fan_out), jnp.float32, -bound, bound)
        params.append((w, b))
    return params


@jax.jit
def torch_dnn_forward(x, params):
    """Full MLP forward: fuse the activation-free layer chain, then run one
    lane-dense Pallas matmul-plus-bias kernel."""
    batch, in_dim = x.shape

    # --- Algebraic fusion of the linear chain (done once per param set) ---
    # y = (((x@W0+b0)@W1+b1)...) == x @ (W0@W1@...) + fused_bias
    w_fused, b_fused = params[0]
    for w, b in params[1:]:
        b_fused = b_fused @ w + b
        w_fused = w_fused @ w
    out_dim = w_fused.shape[1]

    # --- Lane-dense layout: batch -> 128-lane axis, padded for unmasked vst ---
    bp = ((batch + LANE - 1) // LANE) * LANE
    xT = jnp.zeros((in_dim, bp), jnp.float32).at[:, :batch].set(x.T)
    wT = w_fused.T            # (out_dim, in_dim)
    bT = b_fused.T            # (out_dim, 1)

    vmem = pl.BlockSpec(memory_space=pltpu.MemorySpace.VMEM)
    bytes_accessed = 4 * (in_dim * bp + out_dim * in_dim + out_dim + out_dim * bp)
    cost = pl.CostEstimate(
        flops=2 * bp * in_dim * out_dim,
        transcendentals=0,
        bytes_accessed=bytes_accessed,
    )

    outT = pl.pallas_call(
        fused_mlp_kernel,
        out_shape=jax.ShapeDtypeStruct((out_dim, bp), jnp.float32),
        in_specs=[vmem, vmem, vmem],
        out_specs=vmem,
        cost_estimate=cost,
    )(xT, wT, bT)

    # Back to the PyTorch (batch, out_dim) convention.
    return outT[:, :batch].T


def reference_forward(x, params):
    """Unfused pure-JAX reference matching the PyTorch layer-by-layer math."""
    h = x
    for w, b in params:
        h = h @ w + b
    return h


if __name__ == "__main__":
    key = jax.random.PRNGKey(0)
    key, kx = jax.random.split(key)

    # Same shape as the original module's input: X = torch.normal(0, 1, (100, 5))
    batch = 100
    x = jax.random.normal(kx, (batch, INPUT_DIM), jnp.float32)

    params = init_params(key, INPUT_DIM, LAYER_NEURON)
    params = tuple((w, b) for (w, b) in params)

    out = torch_dnn_forward(x, params)
    out = jax.block_until_ready(out)

    # Correctness vs. the unfused reference. Fusion reassociates f32 matmuls,
    # so allow a slightly loosened tolerance.
    ref = reference_forward(x, params)
    assert out.shape == (batch, LAYER_NEURON[-1]), out.shape
    assert jnp.allclose(out, ref, atol=1e-4, rtol=1e-4), "mismatch vs reference"

    print("KERNEL_OK")
</pallas_src>

<mosaic_0001>
module attributes {stable_mosaic.version = 11 : i64} {
  func.func @fused_mlp_kernel(%arg0: memref<5x128xf32, #tpu.memory_space<vmem>>, %arg1: memref<2x5xf32, #tpu.memory_space<vmem>>, %arg2: memref<2x1xf32, #tpu.memory_space<vmem>>, %arg3: memref<2x128xf32, #tpu.memory_space<vmem>>) attributes {dimension_semantics = [], scalar_prefetch = 0 : i64, scratch_operands = 0 : i64, tpu.core_type = #tpu.core_type<tc>} {
    %c0 = arith.constant 0 : index
    %c0_0 = arith.constant 0 : index
    %0 = vector.load %arg1[%c0, %c0_0] : memref<2x5xf32, #tpu.memory_space<vmem>>, vector<2x5xf32>
    %c0_1 = arith.constant 0 : index
    %c0_2 = arith.constant 0 : index
    %1 = vector.load %arg0[%c0_1, %c0_2] : memref<5x128xf32, #tpu.memory_space<vmem>>, vector<5x128xf32>
    %cst = arith.constant dense<0.000000e+00> : vector<2x128xf32>
    %2 = tpu.matmul %0, %1, %cst {dimension_numbers = #tpu.dot_dimension_numbers<[1], [0], [0], [1], [0, 0, 1, 1], [], []>} : vector<2x5xf32>, vector<5x128xf32>, vector<2x128xf32> -> vector<2x128xf32>
    %c0_3 = arith.constant 0 : index
    %c0_4 = arith.constant 0 : index
    %3 = vector.load %arg2[%c0_3, %c0_4] : memref<2x1xf32, #tpu.memory_space<vmem>>, vector<2x1xf32>
    %4 = vector.broadcast %3 : vector<2x1xf32> to vector<2x128xf32>
    %5 = arith.addf %2, %4 : vector<2x128xf32>
    %c0_5 = arith.constant 0 : index
    %c0_6 = arith.constant 0 : index
    %6 = vector.load %arg3[%c0_5, %c0_6] : memref<2x128xf32, #tpu.memory_space<vmem>>, vector<2x128xf32>
    tpu.vector_store %arg3[%c0_5, %c0_6], %5 {strides = array<i32>} : memref<2x128xf32, #tpu.memory_space<vmem>>, vector<2x128xf32>,
    return
  }
}

</mosaic_0001>

<bundles_post_ra>
// kernel: torch_dnn_forward.1
= control target key start
LH: loop header
LB: loop body
LE: loop exit
PB: predicated region body
PF: predicated region fallthrough
CT: control target
= control target key end

     0   :  { %vm26_vm0 = vcmask 1044480   ;;  %vm22_vm1 = vcmask 39936   ;;  %v118_v0 = vmov 0.0   ;;  %vm119_vm2 = vmmov 0   ;;  %s153_s0 = inlined_call_operand.vmem [shape: f32[5,128], index: 0, kind: input, shape index: {}]   ;;  %s154_s1 = inlined_call_operand.vmem [shape: f32[2,5], index: 1, kind: input, shape index: {}]   ;;  %s155_s2 = inlined_call_operand.vmem [shape: f32[2,1], index: 2, kind: input, shape index: {}]   ;;  %s156_s3 = inlined_call_operand.vmem [shape: f32[2,128], index: 3, kind: output, shape index: {}]  }
   0x1   :  { %109 = vmatprep.subr.mxu0 %v118_v0  ;;  %v15_v1 = vld [vmem:[%s153_s0] sm:$0x1f]  ;;  %111 = vmatprep.mubr.msk.f32.mxu0 %vm119_vm2, %v118_v0  ;;  %v120_v3 = vmov 0  }
   0x2   :  { %v14_v2 = vld [vmem:[%s154_s1] sm:$0x3]  ;;  %110 = vmatpush3.msk.msra.mxu0 %vm26_vm0, %v15_v1  ;;  %117 = vset.pattern.permute.xlu0 %v120_v3 }
   0x3   :  { %v16_v4 = vld [vmem:[%s155_s2] sm:$0x3]  ;;  %112 = vmatmul.mubr.msk.f32.vlgmr.msra.gmra.mxu0 %vm22_vm1, %v14_v2 }
   0x4   :  { %19 = vperm.xlu0 %117, %v16_v4  }
  0x7f   :  { %v20_v5 = vpop.permute.xlu0 %19 }
  0xc3   :  { %v96_v6 = vpop.f32.mrf.mxu0 }
  0xc4   :  { %v97_v7 = vadd.f32 %v96_v6, %v20_v5 }
  0xc5   :  { %v113_v8 = vpop.f32.mrf.mxu0 }
  0xc6   :  { %100 = vst [vmem:[%s156_s3] sm:$0x3] %v97_v7 }

</bundles_post_ra>
